<compile_context>
chip_gen: v6e
topology: v6e:2x2x1
jax: 0.10.0
libtpu: 0.0.40
codegen_flags: <defaults>
</compile_context>

<pallas_src>
import jax
import jax.numpy as jnp
from jax.experimental import pallas as pl
from jax.experimental.pallas import tpu as pltpu


def _cdiv(a: int, b: int) -> int:
    return -(-a // b)


def _round_up(a: int, m: int) -> int:
    return _cdiv(a, m) * m


def _make_mean_kernel(inv_d2: float, d2: int, tk: int, mask_tail: bool, direct: bool):
    """Build the kernel. Grid axes: (dim1 tiles, dim3 tiles, dim2 tiles[last])."""

    def kernel(x_ref, o_ref, *scratch):
        acc_ref = o_ref if direct else scratch[0]
        k = pl.program_id(2)

        x = x_ref[...]
        if not direct:
            x = x.astype(jnp.float32)
        if mask_tail:
            # Last dim2 block may extend past d2; OOB contents are undefined.
            idx = jax.lax.broadcasted_iota(jnp.int32, (1, tk, 1), 1)
            x = jnp.where(k * tk + idx < d2, x, 0)
        partial = jnp.sum(x, axis=1)  # (tb, td3)

        @pl.when(k == 0)
        def _():
            acc_ref[...] = partial

        @pl.when(k != 0)
        def _():
            acc_ref[...] = acc_ref[...] + partial

        @pl.when(k == pl.num_programs(2) - 1)
        def _():
            o_ref[...] = (acc_ref[...] * inv_d2).astype(o_ref.dtype)

    return kernel


def mean_reduction(x: jax.Array, *, target_in_bytes: int | None = None) -> jax.Array:
    """Mean over axis 1 of a (D1, D2, D3) array -> (D1, D3)."""
    d1, d2, d3 = x.shape
    dtype = x.dtype
    itemsize = jnp.dtype(dtype).itemsize
    lane = 128
    sub = max(8, 32 // itemsize)  # sublane multiple: 8 (f32), 16 (bf16), 32 (int8)

    # Generation-aware budgets: v5e/v6e have 128 MiB VMEM (bigger tiles, fewer
    # grid steps); v7x has 64 MiB per TC and 2 TCs (keep tiles at 16 MiB).
    try:
        info = pltpu.get_tpu_info()
        vmem_cap = int(getattr(info, "vmem_capacity_bytes", 64 * 1024 * 1024))
    except Exception:  # pragma: no cover - safe fallback
        vmem_cap = 64 * 1024 * 1024
    big_vmem = vmem_cap >= 100 * 1024 * 1024
    target_in = target_in_bytes or ((32 if big_vmem else 16) * 1024 * 1024)
    vmem_limit = (96 if big_vmem else 48) * 1024 * 1024
    two_cores = not big_vmem  # v7x proxy: keep both TensorCores busy

    # ---- tile selection -----------------------------------------------------
    # 1) dim3 (lane) tiling: keep full d3 unless even a (sub, sub, d3) slab
    #    exceeds the per-buffer budget.
    if d3 <= lane or sub * sub * d3 * itemsize <= target_in:
        td3 = d3
    else:
        td3 = max(lane, (target_in // (sub * sub * itemsize)) // lane * lane)
        if td3 >= d3:
            td3 = d3

    # 2) dim2 (reduction) tiling given td3.
    row_bytes = d2 * td3 * itemsize  # one dim1 row over full d2 for one d3 tile
    if sub * row_bytes <= target_in:
        tk = d2  # full reduction extent in one block (no tail mask needed)
        tb = max(sub, (target_in // max(row_bytes, 1)) // sub * sub)
        tb = min(tb, _round_up(d1, sub))
    else:
        tk = max(sub, (target_in // max(sub * td3 * itemsize, 1)) // sub * sub)
        tk = min(tk, _round_up(d2, sub))
        tb = sub

    # 3) Megacore (v7x only): guarantee >= 2 programs across the parallel axes.
    if two_cores and _cdiv(d1, tb) * _cdiv(d3, td3) < 2:
        if d1 > sub:
            tb = max(sub, _round_up(_cdiv(d1, 2), sub))
        elif td3 == d3 and d3 >= 2 * lane:
            td3 = _round_up(_cdiv(d3, 2), lane)

    mask_tail = (d2 % tk) != 0
    direct = dtype == jnp.float32  # accumulate straight into the resident output

    grid = (_cdiv(d1, tb), _cdiv(d3, td3), _cdiv(d2, tk))
    kernel = _make_mean_kernel(1.0 / d2, d2, tk, mask_tail, direct)
    scratch = [] if direct else [pltpu.VMEM((tb, td3), jnp.float32)]

    return pl.pallas_call(
        kernel,
        out_shape=jax.ShapeDtypeStruct((d1, d3), dtype),
        grid_spec=pltpu.PrefetchScalarGridSpec(
            num_scalar_prefetch=0,
            grid=grid,
            in_specs=[pl.BlockSpec((tb, tk, td3), lambda i, j, k: (i, k, j))],
            out_specs=pl.BlockSpec((tb, td3), lambda i, j, k: (i, j)),
            scratch_shapes=scratch,
        ),
        compiler_params=pltpu.CompilerParams(
            dimension_semantics=("parallel", "parallel", "arbitrary"),
            vmem_limit_bytes=vmem_limit,
        ),
        cost_estimate=pl.CostEstimate(
            flops=d1 * d2 * d3,
            transcendentals=0,
            bytes_accessed=(d1 * d2 * d3 + d1 * d3) * itemsize,
        ),
    )(x)


class ModelNew:
    """JAX/Pallas equivalent of the PyTorch ModelNew (mean reduction over dim 1)."""

    def __init__(self, dim: int):
        # Kept for API parity; the reference CUDA kernel always reduces axis 1.
        self.dim = dim

    def __call__(self, x: jax.Array) -> jax.Array:
        return mean_reduction(x)


def _check(out, x, atol=1e-5, rtol=1e-5, name=""):
    ref = jnp.mean(x, axis=1)
    assert out.shape == ref.shape, (name, out.shape, ref.shape)
    assert jnp.allclose(out, ref, atol=atol, rtol=rtol), f"mismatch vs reference: {name}"


if __name__ == "__main__":
    key = jax.random.PRNGKey(0)

    # Main (small) shape consistent with the module: (dim1, dim2, dim3).
    x = jax.random.normal(key, (32, 64, 128), dtype=jnp.float32)
    model = ModelNew(dim=1)
    out = jax.block_until_ready(model(x))
    _check(out, x, name="main")

    # Non-divisible dim1 / dim2 (partial dim1 block, full-d2 block).
    x2 = jax.random.normal(jax.random.PRNGKey(1), (5, 37, 128), dtype=jnp.float32)
    out2 = jax.block_until_ready(mean_reduction(x2))
    _check(out2, x2, name="ragged d1")

    # Force the tiled-d2 path with a ragged tail block (in-kernel masking),
    # by shrinking the per-buffer budget for testing.
    x3 = jax.random.normal(jax.random.PRNGKey(2), (16, 100, 128), dtype=jnp.float32)
    out3 = jax.block_until_ready(mean_reduction(x3, target_in_bytes=64 * 1024))
    _check(out3, x3, name="masked d2 tail")

    # Force d3 tiling (parallel d3 axis) with a ragged d3 tail and partial d1.
    x4 = jax.random.normal(jax.random.PRNGKey(3), (4, 40, 300), dtype=jnp.float32)
    out4 = jax.block_until_ready(mean_reduction(x4, target_in_bytes=64 * 1024))
    _check(out4, x4, name="tiled d3")

    print("KERNEL_OK")
</pallas_src>

<mosaic_0001>
module attributes {stable_mosaic.version = 11 : i64} {
  func.func @kernel(%arg0: i32, %arg1: i32, %arg2: i32, %arg3: memref<16x64x128xf32, #tpu.memory_space<vmem>>, %arg4: memref<16x128xf32, #tpu.memory_space<vmem>>) attributes {dimension_semantics = [#tpu.dimension_semantics<parallel>, #tpu.dimension_semantics<parallel>, #tpu.dimension_semantics<arbitrary>], iteration_bounds = array<i64: 2, 1, 1>, scalar_prefetch = 0 : i64, scratch_operands = 0 : i64, tpu.core_type = #tpu.core_type<tc>, window_params = [{transform_indices = @transform_0, window_bounds = array<i64: 16, 64, 128>}, {transform_indices = @transform_1, window_bounds = array<i64: 16, 128>}]} {
    %c0 = arith.constant 0 : index
    %c0_0 = arith.constant 0 : index
    %c0_1 = arith.constant 0 : index
    %0 = vector.load %arg3[%c0, %c0_0, %c0_1] : memref<16x64x128xf32, #tpu.memory_space<vmem>>, vector<16x64x128xf32>
    %cst = arith.constant dense<0.000000e+00> : vector<16x128xf32>
    %1 = vector.multi_reduction <add>, %0, %cst [1] : vector<16x64x128xf32> to vector<16x128xf32>
    %c0_i32 = arith.constant 0 : i32
    %2 = arith.cmpi eq, %arg2, %c0_i32 : i32
    %3 = arith.extui %2 : i1 to i32
    %c0_i32_2 = arith.constant 0 : i32
    %4 = arith.cmpi ne, %3, %c0_i32_2 : i32
    scf.if %4 {
      %c0_7 = arith.constant 0 : index
      %c0_8 = arith.constant 0 : index
      %11 = vector.load %arg4[%c0_7, %c0_8] : memref<16x128xf32, #tpu.memory_space<vmem>>, vector<16x128xf32>
      tpu.vector_store %arg4[%c0_7, %c0_8], %1 {strides = array<i32>} : memref<16x128xf32, #tpu.memory_space<vmem>>, vector<16x128xf32>,
    } else {
    }
    %c0_i32_3 = arith.constant 0 : i32
    %5 = arith.cmpi ne, %arg2, %c0_i32_3 : i32
    %6 = arith.extui %5 : i1 to i32
    %c0_i32_4 = arith.constant 0 : i32
    %7 = arith.cmpi ne, %6, %c0_i32_4 : i32
    scf.if %7 {
      %c0_7 = arith.constant 0 : index
      %c0_8 = arith.constant 0 : index
      %11 = vector.load %arg4[%c0_7, %c0_8] : memref<16x128xf32, #tpu.memory_space<vmem>>, vector<16x128xf32>
      %12 = arith.addf %11, %1 : vector<16x128xf32>
      %c0_9 = arith.constant 0 : index
      %c0_10 = arith.constant 0 : index
      %13 = vector.load %arg4[%c0_9, %c0_10] : memref<16x128xf32, #tpu.memory_space<vmem>>, vector<16x128xf32>
      tpu.vector_store %arg4[%c0_9, %c0_10], %12 {strides = array<i32>} : memref<16x128xf32, #tpu.memory_space<vmem>>, vector<16x128xf32>,
    } else {
    }
    %c0_i32_5 = arith.constant 0 : i32
    %8 = arith.cmpi eq, %arg2, %c0_i32_5 : i32
    %9 = arith.extui %8 : i1 to i32
    %c0_i32_6 = arith.constant 0 : i32
    %10 = arith.cmpi ne, %9, %c0_i32_6 : i32
    scf.if %10 {
      %c0_7 = arith.constant 0 : index
      %c0_8 = arith.constant 0 : index
      %11 = vector.load %arg4[%c0_7, %c0_8] : memref<16x128xf32, #tpu.memory_space<vmem>>, vector<16x128xf32>
      %cst_9 = arith.constant 1.562500e-02 : f32
      %12 = vector.broadcast %cst_9 : f32 to vector<16x128xf32>
      %13 = arith.mulf %11, %12 : vector<16x128xf32>
      %c0_10 = arith.constant 0 : index
      %c0_11 = arith.constant 0 : index
      %14 = vector.load %arg4[%c0_10, %c0_11] : memref<16x128xf32, #tpu.memory_space<vmem>>, vector<16x128xf32>
      tpu.vector_store %arg4[%c0_10, %c0_11], %13 {strides = array<i32>} : memref<16x128xf32, #tpu.memory_space<vmem>>, vector<16x128xf32>,
    } else {
    }
    return
  }
  func.func @transform_0(%arg0: i32, %arg1: i32, %arg2: i32) -> (i32, i32, i32) {
    %c0_i32 = arith.constant 0 : i32
    return %arg0, %arg2, %arg1 : i32, i32, i32
  }
  func.func @transform_1(%arg0: i32, %arg1: i32, %arg2: i32) -> (i32, i32) {
    %c0_i32 = arith.constant 0 : i32
    return %arg0, %arg1 : i32, i32
  }
}

</mosaic_0001>

<bundles_post_ra>
// kernel: tpu_custom_call.1
= control target key start
LH: loop header
LB: loop body
LE: loop exit
PB: predicated region body
PF: predicated region fallthrough
CT: control target
= control target key end

     0   :  { %6 = vsyncpa [#allocation3], 0  ;;  %s1220_s0 = inlined_call_operand.hbm [shape: f32[32,64,128], index: 0, kind: input, shape index: {}]   ;;  %s1221_s1 = inlined_call_operand.hbm [shape: f32[32,128], index: 1, kind: output, shape index: {}]  }
   0x1   :  { %8 = vsyncpa [#allocation3 + $0x1], 0 }
   0x2   :  { %9 = vsyncpa [#allocation4], 0 }
   0x3   :  { %11 = vsyncpa [#allocation4 + $0x1], 0  ;;  %s922_s6 = smov 0   ;;  %s924_s7 = smov 0  }
   0x4   :  { %s926_s8 = smov 0   ;;  %s928_s9 = smov 0  }
   0x5   :  { %s930_s10 = smov 0   ;;  %s932_s11 = smov 0  }
   0x6 LB: > { %s711_s12 = sadd.s32 4294967295, %s904_s11   ;;  %s712_s13 = sadd.s32 4294967294, %s904_s11   ;;  %s904_s11 = sphi %s932_s11, %s17_s11   ;;  %s900_s10 = sphi %s930_s10, %s1232_s10   ;;  %s896_s9 = sphi %s928_s9, %s1231_s9   ;;  %s892_s8 = sphi %s926_s8, %s1230_s8   ;;  %s888_s7 = sphi %s924_s7, %s1229_s7   ;;  %s884_s6 = sphi %s922_s6, %s1228_s6  }
   0x7   : > { %s36_s14 = sadd.s32 1, %s900_s10  ;;  %s47_s15 = sadd.s32 1, %s892_s8 }
   0x8   : > { %p38_p0 = scmp.ge.s32.totalorder %s36_s14, 2  ;;  %p54_p1 = scmp.ne.s32.totalorder %s892_s8, %s888_s7 }
   0x9   : > { %p55_p2 = scmp.eq.s32.totalorder %s904_s11, 0  ;;  %p60_p3 = scmp.ne.s32.totalorder %s888_s7, %s884_s6 }
   0xa   : > { %s1234_s14 = smov (%p38_p0, %s36_s14), 0  ;;  %p61_p5 = scmp.eq.s32.totalorder %s711_s12, 0 }
   0xb   : > { %p963_p4 = por %p55_p2, %p54_p1  ;;  %s40_s17 = ssub.s32 %s900_s10, %s1234_s14 }
   0xc   : > { %p86_p6 = scmp.eq.s32.totalorder %s711_s12, 1  ;;  %p45_p7 = scmp.eq.s32.totalorder %s40_s17, 0 }
   0xd   : > { %p969_p8 = por %p61_p5, %p60_p3  ;;  %p92_p10 = scmp.eq.s32.totalorder %s712_s13, 1 }
   0xe   : > { %p973_p9 = por %p86_p6, %p54_p1  ;;  %p742_p13 = scmp.lt.s32.totalorder %s904_s11, 2 }
   0xf   : > { %s978_s20 = scalar_select %p45_p7, %s892_s8, %s47_s15  }
  0x10   : > { %p980_p11 = por %p92_p10, %p60_p3  ;;  %s112_s22 = sand.u32 1, %s892_s8  }
  0x11   : > { %s715_s23 = sshll.u32 %s112_s22, 10  ;;  %s728_s24 = sshll.u32 %s900_s10, 14 }
  0x12   : > { %s126_s27 = scalar_lea.hbm %s1220_s0, %s728_s24  ;;  %s116_s28 = scalar_lea.vmem [#allocation2], %s715_s23 }
  0x13   : > { %s127_s29 = sshll.u32 %s116_s28, 4  ;;  %p993_p0 = pnand %p742_p13, %p963_p4  ;;  %s128_s29 = int_to_ptr.vmem [resolvable:$true] %s127_s29 }
  0x14   : > { %p719_p1 = scmp.ge.s32.totalorder %s904_s11, 1  ;;  %s113_s2 = scalar_lea.sflag [#allocation3], %s112_s22 }
  0x15   : > { %p798_p2 = pneg %p993_p0  ;;  %s809_s3 = scalar_lea.vmem %s128_s29, 16384 }
  0x16   : > { %p810_p3 = scmp.ne.s32.totalorder %s128_s29, %s809_s3  ;;  %s906_s4 = smov [#allocation2]  }
  0x17   : > { %s814_s5 = sshll.u32 %s906_s4, 4  ;;  %s815_s5 = int_to_ptr.vmem [resolvable:$false] %s814_s5 }
  0x18   : > { %p812_p5 = pnand %p810_p3, %p798_p2  ;;  %s816_s12 = scalar_lea.vmem %s815_s5, 32768 }
  0x19   : > { %p817_p7 = scmp.lt.s32.totalorder %s128_s29, %s815_s5  ;;  %p818_p10 = scmp.lt.s32.totalorder %s816_s12, %s809_s3 }
  0x1a   : > { %p813_p6 = pneg %p812_p5 }
  0x1b   : > { %p819_p12 = por %p818_p10, %p817_p7 }
  0x1d   : > { %p820_p4 = pnand %p819_p12, %p813_p6 }
  0x1f   : > { %823 = shalt.err (!%p820_p4)
}
  0x20   : > { %s907_s13 = smov 128   ;;  %s908_s15 = smov 8  }
  0x21   : > { %737 = dma.hbm_to_vmem [thread:$0]  (!%p993_p0), %s126_s27, 16384, %s128_s29, %s113_s2, %s907_s13, %s907_s13, %s908_s15  }
  0x22   : > { %p135_p13 = scmp.lt.s32.totalorder %s904_s11, 3 }
  0x24   : > { %p136_p2 = pnand %p719_p1, %p135_p13 }
  0x25   : > { %s1006_s16 = sand.u32 (!%p136_p2), 1, %s888_s7  }
  0x26   : > { %139 = sbr.rel (%p136_p2) target bundleno = 134 (0x86), region = 24  ;;  %s720_s17 = sshll.u32 (!%p136_p2), %s1006_s16, 10 }
  0x27   : > { %s142_s22 = scalar_lea.sflag (!%p136_p2), [#allocation3], %s1006_s16  ;;  %s1010_s23 = scalar_lea.vmem (!%p136_p2), [#allocation2], %s720_s17 }
  0x2b   : > { %875 = dma.done.wait (%p969_p8), %s142_s22, 16384  }
  0x2c   : > { %877 = vsyncadd (%p969_p8), %s142_s22, 4294950912  ;;  %v167_v0 = vld [vmem:[%s1010_s23] sm:$0xff]  ;;  %v168_v1 = vld [vmem:[%s1010_s23 + $0x8] sm:$0xff]  ;;  %vm523_vm0 = vcmask 1041409   ;;  %vm525_vm1 = vcmask 1042434   ;;  %vm527_vm2 = vcmask 1043459  }
  0x2d   : > { %v169_v2 = vld [vmem:[%s1010_s23 + $0x10] sm:$0xff]  ;;  %v295_v3 = vadd.f32 %v168_v1, %v167_v0  ;;  %v170_v4 = vld [vmem:[%s1010_s23 + $0x18] sm:$0xff]  ;;  %v175_v5 = vld [vmem:[%s1010_s23 + $0x40] sm:$0xff]  ;;  %vm529_vm3 = vcmask 1044484   ;;  %vm531_vm4 = vcmask 1045509   ;;  %vm533_vm5 = vcmask 1046534  }
  0x2e   : > { %v176_v6 = vld [vmem:[%s1010_s23 + $0x48] sm:$0xff]  ;;  %v177_v7 = vld [vmem:[%s1010_s23 + $0x50] sm:$0xff]  ;;  %v171_v9 = vld [vmem:[%s1010_s23 + $0x20] sm:$0xff]  ;;  %vm535_vm6 = vcmask 1047559   ;;  %s721_s18 = sshll.u32 %s1006_s16, 4  ;;  %s729_s25 = sshll.u32 %s896_s9, 8 }
  0x2f   : > { %v296_v8 = vadd.f32 %v295_v3, %v169_v2  ;;  %v308_v10 = vadd.f32 %v176_v6, %v175_v5  ;;  %v178_v11 = vld [vmem:[%s1010_s23 + $0x58] sm:$0xff]  ;;  %v183_v12 = vld [vmem:[%s1010_s23 + $0x80] sm:$0xff]  ;;  %v184_v13 = vld [vmem:[%s1010_s23 + $0x88] sm:$0xff]  ;;  %s1152_s24 = scalar_lea.vmem [#allocation5], %s721_s18  ;;  %s1169_s29 = scalar_lea.hbm %s1221_s1, %s729_s25 }
  0x30   : > { %v172_v15 = vld [vmem:[%s1010_s23 + $0x28] sm:$0xff]  ;;  %v185_v16 = vld [vmem:[%s1010_s23 + $0x90] sm:$0xff]  ;;  %v321_v18 = vadd.f32 %v184_v13, %v183_v12  ;;  %v179_v20 = vld [vmem:[%s1010_s23 + $0x60] sm:$0xff]  ;;  %s621_s26 = sshll.u32 %s1152_s24, 4  ;;  %s607_s30 = scalar_lea.sflag [#allocation4], %s1006_s16  ;;  %s1171_s26 = int_to_ptr.vmem [resolvable:$true] %s621_s26 }
  0x31   : > { %v297_v14 = vadd.f32 %v296_v8, %v170_v4  ;;  %v309_v17 = vadd.f32 %v308_v10, %v177_v7  ;;  %v173_v19 = vld [vmem:[%s1010_s23 + $0x30] sm:$0xff]  ;;  %v186_v21 = vld [vmem:[%s1010_s23 + $0x98] sm:$0xff]  ;;  %v191_v23 = vld [vmem:[%s1010_s23 + $0xc0] sm:$0xff]  ;;  %s824_s2 = scalar_lea.vmem %s1171_s26, 256  ;;  %s909_s9 = smov [#allocation5]  }
  0x32   : > { %v192_v24 = vld [vmem:[%s1010_s23 + $0xc8] sm:$0xff]  ;;  %v193_v25 = vld [vmem:[%s1010_s23 + $0xd0] sm:$0xff]  ;;  %v322_v27 = vadd.f32 %v321_v18, %v185_v16  ;;  %v174_v28 = vld [vmem:[%s1010_s23 + $0x38] sm:$0xff]  ;;  %p825_p8 = scmp.ne.s32.totalorder %s1171_s26, %s824_s2  ;;  %s828_s3 = sshll.u32 %s909_s9, 4  ;;  %s829_s3 = int_to_ptr.vmem [resolvable:$false] %s828_s3 }
  0x33   : > { %v298_v22 = vadd.f32 %v297_v14, %v171_v9  ;;  %v310_v26 = vadd.f32 %v309_v17, %v178_v11  ;;  %v180_v29 = vld [vmem:[%s1010_s23 + $0x68] sm:$0xff]  ;;  %v187_v30 = vld [vmem:[%s1010_s23 + $0xa0] sm:$0xff]  ;;  %v334_v32 = vadd.f32 %v192_v24, %v191_v23  ;;  %v181_v33 = vld [vmem:[%s1010_s23 + $0x70] sm:$0xff]  ;;  %s830_s4 = scalar_lea.vmem %s829_s3, 512  ;;  %p831_p1 = scmp.lt.s32.totalorder %s1171_s26, %s829_s3 }
  0x34   : > { %v194_v34 = vld [vmem:[%s1010_s23 + $0xd8] sm:$0xff]  ;;  %v199_v35 = vld [vmem:[%s1010_s23 + $0x100] sm:$0xff]  ;;  %v323_v37 = vadd.f32 %v322_v27, %v186_v21  ;;  %v188_v38 = vld [vmem:[%s1010_s23 + $0xa8] sm:$0xff]  ;;  %p826_p12 = pnand %p825_p8, %p973_p9  ;;  %p832_p3 = scmp.lt.s32.totalorder %s830_s4, %s824_s2 }
  0x35   : > { %v299_v31 = vadd.f32 %v298_v22, %v172_v15  ;;  %v311_v36 = vadd.f32 %v310_v26, %v179_v20  ;;  %v200_v39 = vld [vmem:[%s1010_s23 + $0x108] sm:$0xff]  ;;  %v201_v40 = vld [vmem:[%s1010_s23 + $0x110] sm:$0xff]  ;;  %v335_v42 = vadd.f32 %v334_v32, %v193_v25  ;;  %v182_v43 = vld [vmem:[%s1010_s23 + $0x78] sm:$0xff] }
  0x36   : > { %v189_v44 = vld [vmem:[%s1010_s23 + $0xb0] sm:$0xff]  ;;  %v195_v45 = vld [vmem:[%s1010_s23 + $0xe0] sm:$0xff]  ;;  %v324_v47 = vadd.f32 %v323_v37, %v187_v30  ;;  %v347_v48 = vadd.f32 %v200_v39, %v199_v35  ;;  %v202_v49 = vld [vmem:[%s1010_s23 + $0x118] sm:$0xff]  ;;  %p827_p0 = pneg %p826_p12  ;;  %p833_p5 = por %p832_p3, %p831_p1 }
  0x37   : > { %v300_v41 = vadd.f32 %v299_v31, %v173_v19  ;;  %v312_v46 = vadd.f32 %v311_v36, %v180_v29  ;;  %v207_v50 = vld [vmem:[%s1010_s23 + $0x140] sm:$0xff]  ;;  %v208_v51 = vld [vmem:[%s1010_s23 + $0x148] sm:$0xff]  ;;  %v336_v53 = vadd.f32 %v335_v42, %v194_v34  ;;  %v190_v54 = vld [vmem:[%s1010_s23 + $0xb8] sm:$0xff] }
  0x38   : > { %v196_v55 = vld [vmem:[%s1010_s23 + $0xe8] sm:$0xff]  ;;  %v209_v56 = vld [vmem:[%s1010_s23 + $0x150] sm:$0xff]  ;;  %v325_v58 = vadd.f32 %v324_v47, %v188_v38  ;;  %v348_v59 = vadd.f32 %v347_v48, %v201_v40  ;;  %v360_v60 = vadd.f32 %v208_v51, %v207_v50  ;;  %v203_v62 = vld [vmem:[%s1010_s23 + $0x120] sm:$0xff]  ;;  %p834_p6 = pnand %p833_p5, %p827_p0 }
  0x39   : > { %v301_v52 = vadd.f32 %v300_v41, %v174_v28  ;;  %v313_v57 = vadd.f32 %v312_v46, %v181_v33  ;;  %v197_v61 = vld [vmem:[%s1010_s23 + $0xf0] sm:$0xff]  ;;  %v210_v63 = vld [vmem:[%s1010_s23 + $0x158] sm:$0xff]  ;;  %v337_v1 = vadd.f32 %v336_v53, %v195_v45  ;;  %v215_v2 = vld [vmem:[%s1010_s23 + $0x180] sm:$0xff] }
  0x3a   : > { %v216_v3 = vld [vmem:[%s1010_s23 + $0x188] sm:$0xff]  ;;  %v217_v4 = vld [vmem:[%s1010_s23 + $0x190] sm:$0xff]  ;;  %v326_v6 = vadd.f32 %v325_v58, %v189_v44  ;;  %v349_v7 = vadd.f32 %v348_v59, %v202_v49  ;;  %v361_v8 = vadd.f32 %v360_v60, %v209_v56  ;;  %v211_v10 = vld [vmem:[%s1010_s23 + $0x160] sm:$0xff] }
  0x3b   : > { %v302_v0 = vrot.slane %v301_v52, 4  ;;  %v314_v5 = vadd.f32 %v313_v57, %v182_v43  ;;  %v204_v9 = vld [vmem:[%s1010_s23 + $0x128] sm:$0xff]  ;;  %v338_v12 = vadd.f32 %v337_v1, %v196_v55  ;;  %v373_v13 = vadd.f32 %v216_v3, %v215_v2  ;;  %v198_v14 = vld [vmem:[%s1010_s23 + $0xf8] sm:$0xff]  ;;  %v223_v16 = vld [vmem:[%s1010_s23 + $0x1c0] sm:$0xff] }
  0x3c   : > { %v218_v15 = vld [vmem:[%s1010_s23 + $0x198] sm:$0xff]  ;;  %v327_v18 = vadd.f32 %v326_v6, %v190_v54  ;;  %v350_v19 = vadd.f32 %v349_v7, %v203_v62  ;;  %v362_v20 = vadd.f32 %v361_v8, %v210_v63  ;;  %v205_v21 = vld [vmem:[%s1010_s23 + $0x130] sm:$0xff]  ;;  %v212_v22 = vld [vmem:[%s1010_s23 + $0x168] sm:$0xff] }
  0x3d   : > { %v303_v11 = vadd.f32 %v302_v0, %v301_v52  ;;  %v315_v17 = vrot.slane %v314_v5, 4  ;;  %v224_v23 = vld [vmem:[%s1010_s23 + $0x1c8] sm:$0xff]  ;;  %v339_v25 = vadd.f32 %v338_v12, %v197_v61  ;;  %v374_v26 = vadd.f32 %v373_v13, %v217_v4  ;;  %v219_v27 = vld [vmem:[%s1010_s23 + $0x1a0] sm:$0xff]  ;;  %v225_v28 = vld [vmem:[%s1010_s23 + $0x1d0] sm:$0xff] }
  0x3e   : > { %v328_v30 = vrot.slane %v327_v18, 4  ;;  %v351_v31 = vadd.f32 %v350_v19, %v204_v9  ;;  %v363_v32 = vadd.f32 %v362_v20, %v211_v10  ;;  %v206_v33 = vld [vmem:[%s1010_s23 + $0x138] sm:$0xff]  ;;  %v213_v34 = vld [vmem:[%s1010_s23 + $0x170] sm:$0xff]  ;;  %v386_v38 = vadd.f32 %v224_v23, %v223_v16  ;;  %v220_v39 = vld [vmem:[%s1010_s23 + $0x1a8] sm:$0xff] }
  0x3f   : > { %v304_v24 = vrot.slane %v303_v11, 2  ;;  %v316_v29 = vadd.f32 %v315_v17, %v314_v5  ;;  %v340_v36 = vadd.f32 %v339_v25, %v198_v14  ;;  %v375_v37 = vadd.f32 %v374_v26, %v218_v15  ;;  %v226_v40 = vld [vmem:[%s1010_s23 + $0x1d8] sm:$0xff]  ;;  %v221_v46 = vld [vmem:[%s1010_s23 + $0x1b0] sm:$0xff]  ;;  %v227_v51 = vld [vmem:[%s1010_s23 + $0x1e0] sm:$0xff] }
  0x40   : > { %v329_v42 = vadd.f32 %v328_v30, %v327_v18  ;;  %v352_v43 = vadd.f32 %v351_v31, %v205_v21  ;;  %v364_v44 = vadd.f32 %v363_v32, %v212_v22  ;;  %v214_v45 = vld [vmem:[%s1010_s23 + $0x178] sm:$0xff]  ;;  %v387_v50 = vadd.f32 %v386_v38, %v225_v28  ;;  %v231_v56 = vld [vmem:[%s1010_s23 + $0x200] sm:$0xff]  ;;  %v232_v57 = vld [vmem:[%s1010_s23 + $0x208] sm:$0xff] }
  0x41   : > { %v305_v35 = vadd.f32 %v304_v24, %v303_v11  ;;  %v317_v41 = vrot.slane %v316_v29, 2  ;;  %v341_v48 = vrot.slane %v340_v36, 4  ;;  %v376_v49 = vadd.f32 %v375_v37, %v219_v27  ;;  %v222_v62 = vld [vmem:[%s1010_s23 + $0x1b8] sm:$0xff]  ;;  %v228_v63 = vld [vmem:[%s1010_s23 + $0x1e8] sm:$0xff]  ;;  %v233_v4 = vld [vmem:[%s1010_s23 + $0x210] sm:$0xff] }
  0x42   : > { %v330_v53 = vrot.slane %v329_v42, 2  ;;  %v353_v54 = vadd.f32 %v352_v43, %v206_v33  ;;  %v365_v55 = vadd.f32 %v364_v44, %v213_v34  ;;  %v388_v61 = vadd.f32 %v387_v50, %v226_v40  ;;  %v229_v9 = vld [vmem:[%s1010_s23 + $0x1f0] sm:$0xff]  ;;  %v234_v14 = vld [vmem:[%s1010_s23 + $0x218] sm:$0xff]  ;;  %v239_v18 = vld [vmem:[%s1010_s23 + $0x240] sm:$0xff] }
  0x43   : > { %v306_v47 = vrot.slane %v305_v35, 1  ;;  %v318_v52 = vadd.f32 %v317_v41, %v316_v29  ;;  %v342_v59 = vadd.f32 %v341_v48, %v340_v36  ;;  %v377_v60 = vadd.f32 %v376_v49, %v220_v39  ;;  %v240_v19 = vld [vmem:[%s1010_s23 + $0x248] sm:$0xff]  ;;  %v230_v21 = vld [vmem:[%s1010_s23 + $0x1f8] sm:$0xff]  ;;  %v235_v26 = vld [vmem:[%s1010_s23 + $0x220] sm:$0xff] }
  0x44   : > { %v331_v1 = vadd.f32 %v330_v53, %v329_v42  ;;  %v354_v2 = vrot.slane %v353_v54, 4  ;;  %v366_v3 = vadd.f32 %v365_v55, %v214_v45  ;;  %v389_v7 = vadd.f32 %v388_v61, %v227_v51  ;;  %v241_v30 = vld [vmem:[%s1010_s23 + $0x250] sm:$0xff]  ;;  %v247_v31 = vld [vmem:[%s1010_s23 + $0x280] sm:$0xff]  ;;  %v248_v32 = vld [vmem:[%s1010_s23 + $0x288] sm:$0xff] }
  0x45   : > { %v307_v58 = vadd.f32 %v306_v47, %v305_v35  ;;  %v319_v0 = vrot.slane %v318_v52, 1  ;;  %v343_v5 = vrot.slane %v342_v59, 2  ;;  %v378_v6 = vadd.f32 %v377_v60, %v221_v46  ;;  %v236_v37 = vld [vmem:[%s1010_s23 + $0x228] sm:$0xff]  ;;  %v242_v42 = vld [vmem:[%s1010_s23 + $0x258] sm:$0xff]  ;;  %v249_v43 = vld [vmem:[%s1010_s23 + $0x290] sm:$0xff] }
  0x46   : > { %v399_v8 = vadd.f32 %v232_v57, %v231_v56  ;;  %v332_v11 = vrot.slane %v331_v1, 1  ;;  %v355_v12 = vadd.f32 %v354_v2, %v353_v54  ;;  %v367_v13 = vrot.slane %v366_v3, 4  ;;  %v237_v47 = vld [vmem:[%s1010_s23 + $0x230] sm:$0xff]  ;;  %v255_v48 = vld [vmem:[%s1010_s23 + $0x2c0] sm:$0xff]  ;;  %v256_v49 = vld [vmem:[%s1010_s23 + $0x2c8] sm:$0xff] }
  0x47   : > { %v320_v10 = vadd.f32 %v319_v0, %v318_v52  ;;  %v344_v15 = vadd.f32 %v343_v5, %v342_v59  ;;  %v379_v16 = vadd.f32 %v378_v6, %v222_v62  ;;  %v390_v17 = vadd.f32 %v389_v7, %v228_v63  ;;  %v243_v55 = vld [vmem:[%s1010_s23 + $0x260] sm:$0xff]  ;;  %v250_v56 = vld [vmem:[%s1010_s23 + $0x298] sm:$0xff]  ;;  %v244_v61 = vld [vmem:[%s1010_s23 + $0x268] sm:$0xff] }
  0x48   : > { %v400_v20 = vadd.f32 %v399_v8, %v233_v4  ;;  %v333_v22 = vadd.f32 %v332_v11, %v331_v1  ;;  %v356_v23 = vrot.slane %v355_v12, 2  ;;  %v368_v24 = vadd.f32 %v367_v13, %v366_v3  ;;  %v238_v60 = vld [vmem:[%s1010_s23 + $0x238] sm:$0xff]  ;;  %v257_v62 = vld [vmem:[%s1010_s23 + $0x2d0] sm:$0xff]  ;;  %v251_v3 = vld [vmem:[%s1010_s23 + $0x2a0] sm:$0xff] }
  0x49   : > { %v524_v25 = vsel %vm523_vm0, %v320_v10, %v307_v58  ;;  %v345_v27 = vrot.slane %v344_v15, 1  ;;  %v380_v28 = vrot.slane %v379_v16, 4  ;;  %v391_v29 = vadd.f32 %v390_v17, %v229_v9  ;;  %v263_v4 = vld [vmem:[%s1010_s23 + $0x300] sm:$0xff]  ;;  %v264_v5 = vld [vmem:[%s1010_s23 + $0x308] sm:$0xff]  ;;  %v245_v10 = vld [vmem:[%s1010_s23 + $0x270] sm:$0xff] }
  0x4a   : > { %v401_v33 = vadd.f32 %v400_v20, %v234_v14  ;;  %v357_v34 = vadd.f32 %v356_v23, %v355_v12  ;;  %v369_v35 = vrot.slane %v368_v24, 2  ;;  %v526_v36 = vsel %vm525_vm1, %v333_v22, %v524_v25  ;;  %v252_v11 = vld [vmem:[%s1010_s23 + $0x2a8] sm:$0xff]  ;;  %v258_v12 = vld [vmem:[%s1010_s23 + $0x2d8] sm:$0xff]  ;;  %v265_v17 = vld [vmem:[%s1010_s23 + $0x310] sm:$0xff] }
  0x4b   : > { %v412_v38 = vadd.f32 %v240_v19, %v239_v18  ;;  %v346_v39 = vadd.f32 %v345_v27, %v344_v15  ;;  %v381_v40 = vadd.f32 %v380_v28, %v379_v16  ;;  %v392_v41 = vadd.f32 %v391_v29, %v230_v21  ;;  %v271_v18 = vld [vmem:[%s1010_s23 + $0x340] sm:$0xff]  ;;  %v272_v19 = vld [vmem:[%s1010_s23 + $0x348] sm:$0xff]  ;;  %v246_v23 = vld [vmem:[%s1010_s23 + $0x278] sm:$0xff] }
  0x4c   : > { %v402_v44 = vadd.f32 %v401_v33, %v235_v26  ;;  %v358_v45 = vrot.slane %v357_v34, 1  ;;  %v370_v46 = vadd.f32 %v369_v35, %v368_v24  ;;  %v425_v51 = vadd.f32 %v248_v32, %v247_v31  ;;  %v259_v24 = vld [vmem:[%s1010_s23 + $0x2e0] sm:$0xff]  ;;  %v266_v31 = vld [vmem:[%s1010_s23 + $0x318] sm:$0xff]  ;;  %v273_v32 = vld [vmem:[%s1010_s23 + $0x350] sm:$0xff] }
  0x4d   : > { %v413_v50 = vadd.f32 %v412_v38, %v241_v30  ;;  %v382_v52 = vrot.slane %v381_v40, 2  ;;  %v393_v53 = vrot.slane %v392_v41, 4  ;;  %v528_v54 = vsel %vm527_vm2, %v346_v39, %v526_v36  ;;  %v253_v30 = vld [vmem:[%s1010_s23 + $0x2b0] sm:$0xff]  ;;  %v260_v35 = vld [vmem:[%s1010_s23 + $0x2e8] sm:$0xff]  ;;  %v279_v36 = vld [vmem:[%s1010_s23 + $0x380] sm:$0xff] }
  0x4e   : > { %v403_v57 = vadd.f32 %v402_v44, %v236_v37  ;;  %v359_v58 = vadd.f32 %v358_v45, %v357_v34  ;;  %v371_v59 = vrot.slane %v370_v46, 1  ;;  %v426_v0 = vadd.f32 %v425_v51, %v249_v43  ;;  %v280_v37 = vld [vmem:[%s1010_s23 + $0x388] sm:$0xff]  ;;  %v254_v44 = vld [vmem:[%s1010_s23 + $0x2b8] sm:$0xff]  ;;  %v267_v45 = vld [vmem:[%s1010_s23 + $0x320] sm:$0xff] }
  0x4f   : > { %v414_v63 = vadd.f32 %v413_v50, %v242_v42  ;;  %v383_v1 = vadd.f32 %v382_v52, %v381_v40  ;;  %v394_v2 = vadd.f32 %v393_v53, %v392_v41  ;;  %v438_v7 = vadd.f32 %v256_v49, %v255_v48  ;;  %v261_v49 = vld [vmem:[%s1010_s23 + $0x2f0] sm:$0xff] }
  0x50   : > { %v404_v6 = vadd.f32 %v403_v57, %v237_v47  ;;  %v372_v8 = vadd.f32 %v371_v59, %v370_v46  ;;  %v530_v9 = vsel %vm529_vm3, %v359_v58, %v528_v54  ;;  %v427_v14 = vadd.f32 %v426_v0, %v250_v56  ;;  %v274_v46 = vld [vmem:[%s1010_s23 + $0x358] sm:$0xff]  ;;  %v281_v50 = vld [vmem:[%s1010_s23 + $0x390] sm:$0xff]  ;;  %v268_v57 = vld [vmem:[%s1010_s23 + $0x328] sm:$0xff] }
  0x51   : > { %v415_v13 = vadd.f32 %v414_v63, %v243_v55  ;;  %v384_v15 = vrot.slane %v383_v1, 1  ;;  %v395_v16 = vrot.slane %v394_v2, 2  ;;  %v439_v21 = vadd.f32 %v438_v7, %v257_v62  ;;  %v262_v56 = vld [vmem:[%s1010_s23 + $0x2f8] sm:$0xff]  ;;  %v275_v58 = vld [vmem:[%s1010_s23 + $0x360] sm:$0xff]  ;;  %v288_v0 = vld [vmem:[%s1010_s23 + $0x3c8] sm:$0xff] }
  0x52   : > { %v405_v20 = vadd.f32 %v404_v6, %v238_v60  ;;  %v532_v22 = vsel %vm531_vm4, %v372_v8, %v530_v9  ;;  %v428_v26 = vadd.f32 %v427_v14, %v251_v3  ;;  %v451_v27 = vadd.f32 %v264_v5, %v263_v4  ;;  %v282_v62 = vld [vmem:[%s1010_s23 + $0x398] sm:$0xff]  ;;  %v287_v63 = vld [vmem:[%s1010_s23 + $0x3c0] sm:$0xff]  ;;  %v269_v6 = vld [vmem:[%s1010_s23 + $0x330] sm:$0xff] }
  0x53   : > { %v416_v25 = vadd.f32 %v415_v13, %v244_v61  ;;  %v385_v28 = vadd.f32 %v384_v15, %v383_v1  ;;  %v396_v29 = vadd.f32 %v395_v16, %v394_v2  ;;  %v440_v34 = vadd.f32 %v439_v21, %v258_v12  ;;  %v276_v7 = vld [vmem:[%s1010_s23 + $0x368] sm:$0xff]  ;;  %v289_v12 = vld [vmem:[%s1010_s23 + $0x3d0] sm:$0xff] }
  0x54   : > { %v406_v33 = vrot.slane %v405_v20, 4  ;;  %v429_v39 = vadd.f32 %v428_v26, %v252_v11  ;;  %v452_v40 = vadd.f32 %v451_v27, %v265_v17  ;;  %v464_v41 = vadd.f32 %v272_v19, %v271_v18  ;;  %v283_v11 = vld [vmem:[%s1010_s23 + $0x3a0] sm:$0xff]  ;;  %v270_v17 = vld [vmem:[%s1010_s23 + $0x338] sm:$0xff]  ;;  %v277_v18 = vld [vmem:[%s1010_s23 + $0x370] sm:$0xff] }
  0x55   : > { %v417_v38 = vadd.f32 %v416_v25, %v245_v10  ;;  %v397_v42 = vrot.slane %v396_v29, 1  ;;  %v534_v43 = vsel %vm533_vm5, %v385_v28, %v532_v22  ;;  %v441_v48 = vadd.f32 %v440_v34, %v259_v24  ;;  %v290_v24 = vld [vmem:[%s1010_s23 + $0x3d8] sm:$0xff]  ;;  %v285_v34 = vld [vmem:[%s1010_s23 + $0x3b0] sm:$0xff] }
  0x56   : > { %v407_v47 = vadd.f32 %v406_v33, %v405_v20  ;;  %v430_v52 = vadd.f32 %v429_v39, %v253_v30  ;;  %v453_v53 = vadd.f32 %v452_v40, %v266_v31  ;;  %v465_v54 = vadd.f32 %v464_v41, %v273_v32 }
  0x57   : > { %v418_v51 = vadd.f32 %v417_v38, %v246_v23  ;;  %v398_v55 = vadd.f32 %v397_v42, %v396_v29  ;;  %v442_v60 = vadd.f32 %v441_v48, %v260_v35  ;;  %v477_v61 = vadd.f32 %v280_v37, %v279_v36  ;;  %v284_v23 = vld [vmem:[%s1010_s23 + $0x3a8] sm:$0xff]  ;;  %v278_v29 = vld [vmem:[%s1010_s23 + $0x378] sm:$0xff]  ;;  %v291_v35 = vld [vmem:[%s1010_s23 + $0x3e0] sm:$0xff] }
  0x58   : > { %v408_v59 = vrot.slane %v407_v47, 2  ;;  %v431_v2 = vadd.f32 %v430_v52, %v254_v44  ;;  %v454_v3 = vadd.f32 %v453_v53, %v267_v45  ;;  %v466_v4 = vadd.f32 %v465_v54, %v274_v46  ;;  %v286_v44 = vld [vmem:[%s1010_s23 + $0x3b8] sm:$0xff]  ;;  %v292_v45 = vld [vmem:[%s1010_s23 + $0x3e8] sm:$0xff]  ;;  %v293_v53 = vld [vmem:[%s1010_s23 + $0x3f0] sm:$0xff] }
  0x59   : > { %v419_v1 = vrot.slane %v418_v51, 4  ;;  %v536_v5 = vsel %vm535_vm6, %v398_v55, %v534_v43  ;;  %v443_v9 = vadd.f32 %v442_v60, %v261_v49  ;;  %v478_v10 = vadd.f32 %v477_v61, %v281_v50  ;;  %v294_v61 = vld [vmem:[%s1010_s23 + $0x3f8] sm:$0xff] }
  0x5a   : > { %v409_v8 = vadd.f32 %v408_v59, %v407_v47  ;;  %v432_v14 = vrot.slane %v431_v2, 4  ;;  %v455_v15 = vadd.f32 %v454_v3, %v268_v57  ;;  %v467_v16 = vadd.f32 %v466_v4, %v275_v58 }
  0x5b   : > { %v420_v13 = vadd.f32 %v419_v1, %v418_v51  ;;  %v444_v20 = vadd.f32 %v443_v9, %v262_v56  ;;  %v479_v21 = vadd.f32 %v478_v10, %v282_v62  ;;  %v490_v22 = vadd.f32 %v288_v0, %v287_v63 }
  0x5c   : > { %v410_v19 = vrot.slane %v409_v8, 1  ;;  %v433_v26 = vadd.f32 %v432_v14, %v431_v2  ;;  %v456_v27 = vadd.f32 %v455_v15, %v269_v6  ;;  %v468_v28 = vadd.f32 %v467_v16, %v276_v7 }
  0x5d   : > { %v421_v25 = vrot.slane %v420_v13, 2  ;;  %v445_v31 = vrot.slane %v444_v20, 4  ;;  %v480_v32 = vadd.f32 %v479_v21, %v283_v11  ;;  %v491_v33 = vadd.f32 %v490_v22, %v289_v12 }
  0x5e   : > { %v411_v30 = vadd.f32 %v410_v19, %v409_v8  ;;  %v434_v37 = vrot.slane %v433_v26, 2  ;;  %v457_v38 = vadd.f32 %v456_v27, %v270_v17  ;;  %v469_v39 = vadd.f32 %v468_v28, %v277_v18 }
  0x5f   : > { %v422_v36 = vadd.f32 %v421_v25, %v420_v13  ;;  %v446_v40 = vadd.f32 %v445_v31, %v444_v20  ;;  %v481_v41 = vadd.f32 %v480_v32, %v284_v23  ;;  %v492_v42 = vadd.f32 %v491_v33, %v290_v24 }
  0x60   : > { %v602_v43 = vmul.f32 0.015625, %v536_v5  ;;  %v435_v47 = vadd.f32 %v434_v37, %v433_v26  ;;  %v458_v48 = vrot.slane %v457_v38, 4  ;;  %v470_v49 = vadd.f32 %v469_v39, %v278_v29 }
  0x61   : > { %v423_v46 = vrot.slane %v422_v36, 1  ;;  %v447_v50 = vrot.slane %v446_v40, 2  ;;  %v482_v51 = vadd.f32 %v481_v41, %v285_v34  ;;  %v493_v52 = vadd.f32 %v492_v42, %v291_v35 }
  0x62   : > { %604 = vst [vmem:[%s1152_s24] sm:$0xff] %v602_v43  ;;  %v436_v55 = vrot.slane %v435_v47, 1  ;;  %v459_v56 = vadd.f32 %v458_v48, %v457_v38  ;;  %v471_v57 = vrot.slane %v470_v49, 4 }
  0x63   : > { %v424_v54 = vadd.f32 %v423_v46, %v422_v36  ;;  %v448_v58 = vadd.f32 %v447_v50, %v446_v40  ;;  %v483_v59 = vadd.f32 %v482_v51, %v286_v44  ;;  %v494_v60 = vadd.f32 %v493_v52, %v292_v45 }
  0x64   : > { %v437_v62 = vadd.f32 %v436_v55, %v435_v47  ;;  %v460_v63 = vrot.slane %v459_v56, 2  ;;  %v472_v0 = vadd.f32 %v471_v57, %v470_v49 }
  0x65   : > { %v537_v1 = vsel %vm523_vm0, %v424_v54, %v411_v30  ;;  %v449_v2 = vrot.slane %v448_v58, 1  ;;  %v484_v3 = vrot.slane %v483_v59, 4  ;;  %v495_v4 = vadd.f32 %v494_v60, %v293_v53 }
  0x66   : > { %v461_v5 = vadd.f32 %v460_v63, %v459_v56  ;;  %v473_v6 = vrot.slane %v472_v0, 2  ;;  %v538_v7 = vsel %vm525_vm1, %v437_v62, %v537_v1 }
  0x67   : > { %v450_v8 = vadd.f32 %v449_v2, %v448_v58  ;;  %v485_v9 = vadd.f32 %v484_v3, %v483_v59  ;;  %v496_v10 = vadd.f32 %v495_v4, %v294_v61 }
  0x68   : > { %v462_v11 = vrot.slane %v461_v5, 1  ;;  %v474_v12 = vadd.f32 %v473_v6, %v472_v0 }
  0x69   : > { %v486_v13 = vrot.slane %v485_v9, 2  ;;  %v497_v14 = vrot.slane %v496_v10, 4  ;;  %v539_v15 = vsel %vm527_vm2, %v450_v8, %v538_v7 }
  0x6a   : > { %v463_v16 = vadd.f32 %v462_v11, %v461_v5  ;;  %v475_v17 = vrot.slane %v474_v12, 1 }
  0x6b   : > { %v487_v18 = vadd.f32 %v486_v13, %v485_v9  ;;  %v498_v19 = vadd.f32 %v497_v14, %v496_v10 }
  0x6c   : > { %v476_v20 = vadd.f32 %v475_v17, %v474_v12  ;;  %v540_v21 = vsel %vm529_vm3, %v463_v16, %v539_v15 }
  0x6d   : > { %v488_v22 = vrot.slane %v487_v18, 1  ;;  %v499_v23 = vrot.slane %v498_v19, 2 }
  0x6e   : > { %v541_v26 = vsel %vm531_vm4, %v476_v20, %v540_v21 }
  0x6f   : > { %v489_v24 = vadd.f32 %v488_v22, %v487_v18  ;;  %v500_v25 = vadd.f32 %v499_v23, %v498_v19 }
  0x71   : > { %v501_v27 = vrot.slane %v500_v25, 1  ;;  %v542_v28 = vsel %vm533_vm5, %v489_v24, %v541_v26 }
  0x73   : > { %v502_v29 = vadd.f32 %v501_v27, %v500_v25 }
  0x75   : > { %v543_v30 = vsel %vm535_vm6, %v502_v29, %v542_v28 }
  0x76   : > { %v603_v31 = vmul.f32 0.015625, %v543_v30 }
  0x78   : > { %605 = vst [vmem:[%s1152_s24 + $0x8] sm:$0xff] %v603_v31 }
  0x79   : > { %837 = shalt.err (!%p834_p6)
}
  0x7a   : > { %s838_s5 = scalar_lea.hbm %s1169_s29, 256  ;;  %s842_s15 = scalar_lea.hbm %s1221_s1, 512 }
  0x7b   : > { %p839_p7 = scmp.ne.s32.totalorder %s1169_s29, %s838_s5  ;;  %p843_p13 = scmp.lt.s32.totalorder %s1169_s29, %s1221_s1 }
  0x7c   : > { %p844_p2 = scmp.lt.s32.totalorder %s842_s15, %s838_s5 }
  0x7d   : > { %p840_p10 = pnand %p839_p7, %p973_p9 }
  0x7e   : > { %p845_p8 = por %p844_p2, %p843_p13 }
  0x7f   : > { %p841_p4 = pneg %p840_p10 }
  0x81   : > { %p846_p12 = pnand %p845_p8, %p841_p4 }
  0x83   : > { %849 = shalt.err (!%p846_p12)
}
  0x84   : > { %s910_s23 = smov 128   ;;  %s911_s18 = smov 8  }
  0x85   : > { %732 = dma.vmem_to_hbm [thread:$0]  (%p973_p9), %s1171_s26, 256, %s1169_s29, %s607_s30, %s910_s23, %s910_s23, %s911_s18  }
  0x86 PF: > { %s636_s24 = sand.u32 1, %s884_s6   ;;  %p1227_p0 = scmp.ge.s32.totalorder %s904_s11, 2 }
  0x87   : > { %s637_s25 = scalar_lea.sflag [#allocation4], %s636_s24 }
  0x88   : > { %p739_p1 = pnand %p1227_p0, %p980_p11 }
  0x8a   : > { %p740_p3 = pneg %p739_p1 }
  0x8c   : > { %879 = dma.done.wait (%p740_p3), %s637_s25, 256  }
  0x8d   : > { %881 = vsyncadd (%p740_p3), %s637_s25, 4294967040  ;;  %s17_s11 = sadd.s32 1, %s904_s11   ;;  %s1228_s6 = smov %s888_s7 }
  0x8e   : > { %p14_p5 = scmp.ge.s32.totalorder %s17_s11, 4   ;;  %s1229_s7 = smov %s892_s8 }
  0x8f   : > { %s1230_s8 = smov %s978_s20  ;;  %s1231_s9 = smov %s900_s10 }
  0x90   : > { %s1232_s10 = smov %s1234_s14  ;;  %16 = sbr.rel (!%p14_p5) target bundleno = 6 (0x6), region = 81 }
  0x95   :  { %642 = vsyncpa [#allocation3], 1 }
  0x96   :  { %644 = vsyncpa [#allocation3 + $0x1], 1 }
  0x97   :  { %645 = vsyncpa [#allocation4], 1 }
  0x98   :  { %647 = vsyncpa [#allocation4 + $0x1], 1 }

</bundles_post_ra>
